<compile_context>
chip_gen: v7x
topology: tpu7x:2x2x1
jax: 0.10.0
libtpu: 0.0.40
codegen_flags: <defaults>
</compile_context>

<pallas_src>
import jax
import jax.numpy as jnp
from jax.experimental import pallas as pl
from jax.experimental.pallas import tpu as pltpu

# ----------------------------------------------------------------------------
# Problem constants (mirroring the PyTorch script)
# ----------------------------------------------------------------------------
LENGTH = 1.0
AREA = 20.0
FORCE = 100.0
TRACTION = FORCE / AREA            # 5.0
VOLUME_FORCE = 0.0
MIN_YOUNGS_MODULUS = 180.0
MAX_COORDINATE = LENGTH


def calculate_displacements_solution_1d(coordinates, length, youngs_modulus,
                                        traction, volume_force):
    return (traction / youngs_modulus * coordinates
            + volume_force / youngs_modulus
            * (length * coordinates - 0.5 * coordinates ** 2))


MAX_DISPLACEMENT = calculate_displacements_solution_1d(
    coordinates=MAX_COORDINATE, length=LENGTH,
    youngs_modulus=MIN_YOUNGS_MODULUS, traction=TRACTION,
    volume_force=VOLUME_FORCE)        # = 5/180 ≈ 0.027778

IN_DIM = 2      # (x_coordinate, youngs_modulus)
HIDDEN = 32
OUT_DIM = 1
BLOCK_N = 1024  # batch tile along the lane axis (multiple of 128)


# ----------------------------------------------------------------------------
# Pallas kernel: full Ansatz forward for one batch tile (batch on lanes)
# ----------------------------------------------------------------------------
def ansatz_kernel(xt_ref, w1x_ref, w1e_ref, b1_ref, w2t_ref, b2_ref,
                  w3c_ref, b3_ref, out_ref):
    xt = xt_ref[...]                                   # (IN_DIM, BN) f32
    x_coor = xt[0:1, :]                                # (1, BN)
    e_mod = xt[1:2, :]                                 # (1, BN)

    # --- Layer 1 (2 -> H): K=2 contraction on the VPU (MXU would be ~1/128
    #     utilized).  Weight columns come pre-split from the wrapper.
    pre1 = (w1x_ref[...] * x_coor
            + w1e_ref[...] * e_mod
            + b1_ref[...])                             # (H, BN)
    h1 = jnp.tanh(pre1)                                # EUP

    # --- Layer 2 (H -> H): MXU matmul, lane-dense (H, BN) result.
    h2 = jnp.tanh(
        jnp.dot(w2t_ref[...], h1, preferred_element_type=jnp.float32)
        + b2_ref[...])                                 # (H, BN)

    # --- Layer 3 (H -> 1): VPU multiply + XLU sublane reduce (avoids an M=1
    #     matmul and runs on slots the layer-2 matmul does not use).
    y = jnp.sum(w3c_ref[...] * h2, axis=0, keepdims=True) + b3_ref[...]  # (1, BN)

    # --- Ansatz: u = (G_u + D_u * Nnet(inputs)) * max_displacement,  G_u = 0
    out_ref[...] = x_coor * y * jnp.float32(MAX_DISPLACEMENT)


def ansatz_forward(inputs, params, block_n=BLOCK_N):
    """inputs: (N, 2) float32 (any N). Returns (N,) float32."""
    assert block_n % 128 == 0, "block_n must be a multiple of 128 (lane width)"
    n = inputs.shape[0]
    w1, b1, w2, b2, w3, b3 = params

    # Pad the batch to a multiple of block_n; padded columns are zeros
    # (harmless: x_coor = 0 -> u = 0) and are sliced off after the call.
    n_pad = max(block_n, ((n + block_n - 1) // block_n) * block_n)
    inputs_p = inputs.astype(jnp.float32)
    if n_pad != n:
        inputs_p = jnp.pad(inputs_p, ((0, n_pad - n), (0, 0)))

    # Layout plumbing done once in the wrapper: batch goes on the lane axis,
    # layer-1 weight is pre-split into per-input columns.
    xt = inputs_p.T                         # (IN_DIM, n_pad)
    w1x = w1[0].reshape(HIDDEN, 1)          # (HIDDEN, 1) — coordinate column
    w1e = w1[1].reshape(HIDDEN, 1)          # (HIDDEN, 1) — modulus column
    b1c = b1.reshape(HIDDEN, 1)             # (HIDDEN, 1)
    w2t = w2.T                              # (HIDDEN, HIDDEN)
    b2c = b2.reshape(HIDDEN, 1)             # (HIDDEN, 1)
    w3c = w3.reshape(HIDDEN, OUT_DIM)       # (HIDDEN, 1)
    b3s = b3.reshape(1, 1)                  # (1, 1)

    grid = (n_pad // block_n,)
    resident = lambda shape: pl.BlockSpec(shape, lambda i: (0, 0))

    out = pl.pallas_call(
        ansatz_kernel,
        out_shape=jax.ShapeDtypeStruct((1, n_pad), jnp.float32),
        grid_spec=pltpu.PrefetchScalarGridSpec(
            num_scalar_prefetch=0,
            grid=grid,
            in_specs=[
                pl.BlockSpec((IN_DIM, block_n), lambda i: (0, i)),  # x^T tile
                resident((HIDDEN, 1)),                              # w1[:,x]
                resident((HIDDEN, 1)),                              # w1[:,E]
                resident((HIDDEN, 1)),                              # b1
                resident((HIDDEN, HIDDEN)),                         # w2^T
                resident((HIDDEN, 1)),                              # b2
                resident((HIDDEN, OUT_DIM)),                        # w3 (column)
                resident((1, 1)),                                   # b3
            ],
            out_specs=pl.BlockSpec((1, block_n), lambda i: (0, i)),
        ),
        compiler_params=pltpu.CompilerParams(
            dimension_semantics=("parallel",)),
    )(xt, w1x, w1e, b1c, w2t, b2c, w3c, b3s)

    # matches .reshape(-1) in the PyTorch forward; drop the padded tail.
    return out.reshape(-1)[:n]


# ----------------------------------------------------------------------------
# Deterministic parameter init (synthetic Nnet weights, (in, out) layout)
# ----------------------------------------------------------------------------
def init_params(key):
    k1, k2, k3 = jax.random.split(key, 3)
    w1 = jax.random.normal(k1, (IN_DIM, HIDDEN), jnp.float32) * 0.5
    b1 = jnp.zeros((HIDDEN,), jnp.float32)
    w2 = jax.random.normal(k2, (HIDDEN, HIDDEN), jnp.float32) * 0.2
    b2 = jnp.zeros((HIDDEN,), jnp.float32)
    w3 = jax.random.normal(k3, (HIDDEN, OUT_DIM), jnp.float32) * 0.2
    b3 = jnp.zeros((OUT_DIM,), jnp.float32)
    return (w1, b1, w2, b2, w3, b3)


def reference_forward(inputs, params):
    """Pure-JAX reference of the same forward (for correctness check)."""
    w1, b1, w2, b2, w3, b3 = params
    h1 = jnp.tanh(inputs @ w1 + b1)
    h2 = jnp.tanh(h1 @ w2 + b2)
    y = (h2 @ w3 + b3).reshape(-1)
    return inputs[:, 0] * y * MAX_DISPLACEMENT


if __name__ == "__main__":
    key = jax.random.PRNGKey(0)
    kx, kp = jax.random.split(key)

    # Non-multiple-of-tile batch to exercise padding; 3 grid steps at BLOCK_N=1024.
    N = 2500
    # inputs: column 0 = coordinate in [0, length], column 1 = Young's modulus
    coords = jax.random.uniform(kx, (N, 1), jnp.float32, 0.0, LENGTH)
    emod = jnp.full((N, 1), MIN_YOUNGS_MODULUS, jnp.float32)
    inputs = jnp.concatenate([coords, emod], axis=1)   # (N, 2)

    params = init_params(kp)

    u = ansatz_forward(inputs, params)
    u = jax.block_until_ready(u)

    u_ref = reference_forward(inputs, params)
    assert u.shape == (N,)
    assert jnp.allclose(u, u_ref, atol=1e-5, rtol=1e-5)

    print("KERNEL_OK")
</pallas_src>

<mosaic_0001>
module attributes {stable_mosaic.version = 11 : i64} {
  func.func @ansatz_kernel(%arg0: i32, %arg1: memref<2x1024xf32, #tpu.memory_space<vmem>>, %arg2: memref<32x1xf32, #tpu.memory_space<vmem>>, %arg3: memref<32x1xf32, #tpu.memory_space<vmem>>, %arg4: memref<32x1xf32, #tpu.memory_space<vmem>>, %arg5: memref<32x32xf32, #tpu.memory_space<vmem>>, %arg6: memref<32x1xf32, #tpu.memory_space<vmem>>, %arg7: memref<32x1xf32, #tpu.memory_space<vmem>>, %arg8: memref<1x1xf32, #tpu.memory_space<vmem>>, %arg9: memref<1x1024xf32, #tpu.memory_space<vmem>>) attributes {dimension_semantics = [#tpu.dimension_semantics<parallel>], iteration_bounds = array<i64: 3>, scalar_prefetch = 0 : i64, scratch_operands = 0 : i64, tpu.core_type = #tpu.core_type<tc>, window_params = [{transform_indices = @transform_0, window_bounds = array<i64: 2, 1024>}, {pipeline_mode = #tpu.pipeline_mode<synchronous>, transform_indices = @transform_1, window_bounds = array<i64: 32, 1>}, {pipeline_mode = #tpu.pipeline_mode<synchronous>, transform_indices = @transform_2, window_bounds = array<i64: 32, 1>}, {pipeline_mode = #tpu.pipeline_mode<synchronous>, transform_indices = @transform_3, window_bounds = array<i64: 32, 1>}, {pipeline_mode = #tpu.pipeline_mode<synchronous>, transform_indices = @transform_4, window_bounds = array<i64: 32, 32>}, {pipeline_mode = #tpu.pipeline_mode<synchronous>, transform_indices = @transform_5, window_bounds = array<i64: 32, 1>}, {pipeline_mode = #tpu.pipeline_mode<synchronous>, transform_indices = @transform_6, window_bounds = array<i64: 32, 1>}, {pipeline_mode = #tpu.pipeline_mode<synchronous>, transform_indices = @transform_7, window_bounds = array<i64: 1, 1>}, {transform_indices = @transform_8, window_bounds = array<i64: 1, 1024>}]} {
    %c0 = arith.constant 0 : index
    %c0_0 = arith.constant 0 : index
    %0 = vector.load %arg1[%c0, %c0_0] : memref<2x1024xf32, #tpu.memory_space<vmem>>, vector<2x1024xf32>
    %1 = vector.extract_strided_slice %0 {offsets = [0, 0], sizes = [1, 1024], strides = [1, 1]} : vector<2x1024xf32> to vector<1x1024xf32>
    %2 = vector.extract_strided_slice %0 {offsets = [1, 0], sizes = [1, 1024], strides = [1, 1]} : vector<2x1024xf32> to vector<1x1024xf32>
    %c0_1 = arith.constant 0 : index
    %c0_2 = arith.constant 0 : index
    %3 = vector.load %arg2[%c0_1, %c0_2] : memref<32x1xf32, #tpu.memory_space<vmem>>, vector<32x1xf32>
    %4 = vector.broadcast %3 : vector<32x1xf32> to vector<32x1024xf32>
    %5 = vector.broadcast %1 : vector<1x1024xf32> to vector<32x1024xf32>
    %6 = arith.mulf %4, %5 : vector<32x1024xf32>
    %c0_3 = arith.constant 0 : index
    %c0_4 = arith.constant 0 : index
    %7 = vector.load %arg3[%c0_3, %c0_4] : memref<32x1xf32, #tpu.memory_space<vmem>>, vector<32x1xf32>
    %8 = vector.broadcast %7 : vector<32x1xf32> to vector<32x1024xf32>
    %9 = vector.broadcast %2 : vector<1x1024xf32> to vector<32x1024xf32>
    %10 = arith.mulf %8, %9 : vector<32x1024xf32>
    %11 = arith.addf %6, %10 : vector<32x1024xf32>
    %c0_5 = arith.constant 0 : index
    %c0_6 = arith.constant 0 : index
    %12 = vector.load %arg4[%c0_5, %c0_6] : memref<32x1xf32, #tpu.memory_space<vmem>>, vector<32x1xf32>
    %13 = vector.broadcast %12 : vector<32x1xf32> to vector<32x1024xf32>
    %14 = arith.addf %11, %13 : vector<32x1024xf32>
    %15 = math.tanh %14 : vector<32x1024xf32>
    %c0_7 = arith.constant 0 : index
    %c0_8 = arith.constant 0 : index
    %16 = vector.load %arg5[%c0_7, %c0_8] : memref<32x32xf32, #tpu.memory_space<vmem>>, vector<32x32xf32>
    %cst = arith.constant dense<0.000000e+00> : vector<32x1024xf32>
    %17 = tpu.matmul %16, %15, %cst {dimension_numbers = #tpu.dot_dimension_numbers<[1], [0], [0], [1], [0, 0, 1, 1], [], []>} : vector<32x32xf32>, vector<32x1024xf32>, vector<32x1024xf32> -> vector<32x1024xf32>
    %c0_9 = arith.constant 0 : index
    %c0_10 = arith.constant 0 : index
    %18 = vector.load %arg6[%c0_9, %c0_10] : memref<32x1xf32, #tpu.memory_space<vmem>>, vector<32x1xf32>
    %19 = vector.broadcast %18 : vector<32x1xf32> to vector<32x1024xf32>
    %20 = arith.addf %17, %19 : vector<32x1024xf32>
    %21 = math.tanh %20 : vector<32x1024xf32>
    %c0_11 = arith.constant 0 : index
    %c0_12 = arith.constant 0 : index
    %22 = vector.load %arg7[%c0_11, %c0_12] : memref<32x1xf32, #tpu.memory_space<vmem>>, vector<32x1xf32>
    %23 = vector.broadcast %22 : vector<32x1xf32> to vector<32x1024xf32>
    %24 = arith.mulf %23, %21 : vector<32x1024xf32>
    %cst_13 = arith.constant dense<0.000000e+00> : vector<1024xf32>
    %25 = vector.multi_reduction <add>, %24, %cst_13 [0] : vector<32x1024xf32> to vector<1024xf32>
    %26 = vector.shape_cast %25 : vector<1024xf32> to vector<1x1024xf32>
    %c0_14 = arith.constant 0 : index
    %c0_15 = arith.constant 0 : index
    %27 = vector.load %arg8[%c0_14, %c0_15] : memref<1x1xf32, #tpu.memory_space<vmem>>, vector<1x1xf32>
    %28 = vector.broadcast %27 : vector<1x1xf32> to vector<1x1024xf32>
    %29 = arith.addf %26, %28 : vector<1x1024xf32>
    %30 = arith.mulf %1, %29 : vector<1x1024xf32>
    %cst_16 = arith.constant 0.027777778 : f32
    %31 = vector.broadcast %cst_16 : f32 to vector<1x1024xf32>
    %32 = arith.mulf %30, %31 : vector<1x1024xf32>
    %c0_17 = arith.constant 0 : index
    %c0_18 = arith.constant 0 : index
    %33 = vector.load %arg9[%c0_17, %c0_18] : memref<1x1024xf32, #tpu.memory_space<vmem>>, vector<1x1024xf32>
    tpu.vector_store %arg9[%c0_17, %c0_18], %32 {strides = array<i32>} : memref<1x1024xf32, #tpu.memory_space<vmem>>, vector<1x1024xf32>,
    return
  }
  func.func @transform_0(%arg0: i32) -> (i32, i32) {
    %c0_i32 = arith.constant 0 : i32
    %c0_i32_0 = arith.constant 0 : i32
    return %c0_i32, %arg0 : i32, i32
  }
  func.func @transform_1(%arg0: i32) -> (i32, i32) {
    %c0_i32 = arith.constant 0 : i32
    %c0_i32_0 = arith.constant 0 : i32
    %c0_i32_1 = arith.constant 0 : i32
    return %c0_i32, %c0_i32_0 : i32, i32
  }
  func.func @transform_2(%arg0: i32) -> (i32, i32) {
    %c0_i32 = arith.constant 0 : i32
    %c0_i32_0 = arith.constant 0 : i32
    %c0_i32_1 = arith.constant 0 : i32
    return %c0_i32, %c0_i32_0 : i32, i32
  }
  func.func @transform_3(%arg0: i32) -> (i32, i32) {
    %c0_i32 = arith.constant 0 : i32
    %c0_i32_0 = arith.constant 0 : i32
    %c0_i32_1 = arith.constant 0 : i32
    return %c0_i32, %c0_i32_0 : i32, i32
  }
  func.func @transform_4(%arg0: i32) -> (i32, i32) {
    %c0_i32 = arith.constant 0 : i32
    %c0_i32_0 = arith.constant 0 : i32
    %c0_i32_1 = arith.constant 0 : i32
    return %c0_i32, %c0_i32_0 : i32, i32
  }
  func.func @transform_5(%arg0: i32) -> (i32, i32) {
    %c0_i32 = arith.constant 0 : i32
    %c0_i32_0 = arith.constant 0 : i32
    %c0_i32_1 = arith.constant 0 : i32
    return %c0_i32, %c0_i32_0 : i32, i32
  }
  func.func @transform_6(%arg0: i32) -> (i32, i32) {
    %c0_i32 = arith.constant 0 : i32
    %c0_i32_0 = arith.constant 0 : i32
    %c0_i32_1 = arith.constant 0 : i32
    return %c0_i32, %c0_i32_0 : i32, i32
  }
  func.func @transform_7(%arg0: i32) -> (i32, i32) {
    %c0_i32 = arith.constant 0 : i32
    %c0_i32_0 = arith.constant 0 : i32
    %c0_i32_1 = arith.constant 0 : i32
    return %c0_i32, %c0_i32_0 : i32, i32
  }
  func.func @transform_8(%arg0: i32) -> (i32, i32) {
    %c0_i32 = arith.constant 0 : i32
    %c0_i32_0 = arith.constant 0 : i32
    return %c0_i32, %arg0 : i32, i32
  }
}

</mosaic_0001>

<bundles_post_ra>
// kernel: tpu_custom_call.1
= control target key start
LH: loop header
LB: loop body
LE: loop exit
PB: predicated region body
PF: predicated region fallthrough
CT: control target
= control target key end

     0   :  { %s2327_s0 = inlined_call_operand.vmem [shape: f32[2,3072], index: 0, kind: input, shape index: {}]   ;;  %s2328_s1 = inlined_call_operand.vmem [shape: f32[32,1], index: 1, kind: input, shape index: {}]   ;;  %s2329_s2 = inlined_call_operand.vmem [shape: f32[32,1], index: 2, kind: input, shape index: {}]   ;;  %s2330_s3 = inlined_call_operand.vmem [shape: f32[32,1], index: 3, kind: input, shape index: {}]   ;;  %s2331_s4 = inlined_call_operand.vmem [shape: f32[32,32], index: 4, kind: input, shape index: {}]   ;;  %s2332_s5 = inlined_call_operand.vmem [shape: f32[32,1], index: 5, kind: input, shape index: {}]   ;;  %s2333_s6 = inlined_call_operand.vmem [shape: f32[32,1], index: 6, kind: input, shape index: {}]   ;;  %s2334_s7 = inlined_call_operand.<no memory space> [shape: f32[1,1], index: 7, kind: input, shape index: {}]   ;;  %s2335_s8 = inlined_call_operand.hbm [shape: f32[1,3072], index: 8, kind: output, shape index: {}]  }
   0x1   :  { %v13_v0 = vstv %s2334_s7 }
   0x2   :  { %14 = vst [vmem:[#allocation2] sm:$0x1] %v13_v0 }
   0x3   :  { %15 = vsyncpa [#allocation4], 0 }
   0x4   :  { %17 = vsyncpa [#allocation4 + $0x1], 0  ;;  %s1758_s29 = smov 0   ;;  %s1760_s30 = smov 0  }
   0x5   :  { %s1762_s9 = smov 0   ;;  %s1764_s10 = smov 0  }
   0x6 LB: > { %s1779_s7 = sadd.s32 4294967295, %s1703_s10   ;;  %s1405_s11 = sadd.s32 4294967294, %s1703_s10   ;;  %s1703_s10 = sphi %s1764_s10, %s2357_s10   ;;  %s1699_s9 = sphi %s1762_s9, %s2356_s9   ;;  %s1695_s30 = sphi %s1760_s30, %s2355_s30   ;;  %s1691_s29 = sphi %s1758_s29, %s2354_s29  }
   0x7   : > { %s1783_s12 = sadd.s32 1, %s1703_s10   ;;  %s203_s13 = sadd.s32 1, %s1699_s9 }
   0x8   : > { %s200_s14 = ssub.s32 %s1703_s10, %s1783_s12  ;;  %p213_p0 = scmp.ne.s32.totalorder %s1699_s9, %s1695_s30 }
   0x9   : > { %p201_p1 = scmp.eq.s32.totalorder %s200_s14, 0  ;;  %p214_p2 = scmp.eq.s32.totalorder %s1779_s7, 2 }
   0xa   : > { %p219_p3 = scmp.ne.s32.totalorder %s1695_s30, %s1691_s29  ;;  %p220_p4 = scmp.eq.s32.totalorder %s1405_s11, 2 }
   0xb   : > { %s1794_s15 = scalar_select %p201_p1, %s1699_s9, %s203_s13  }
   0xc   : > { %p1796_p5 = por %p214_p2, %p213_p0  ;;  %p1800_p6 = por %p220_p4, %p219_p3 }
   0xd   : > { %p1408_p7 = scmp.ge.s32.totalorder %s1703_s10, 1  ;;  %p268_p8 = scmp.lt.s32.totalorder %s1703_s10, 4 }
   0xf   : > { %p269_p9 = pnand %p1408_p7, %p268_p8 }
  0x11   : > { %272 = sbr.rel (%p269_p9) target bundleno = 511 (0x1ff), region = 52 }
  0x18   : > { %v441_v1 = vld [vmem:[%s2329_s2] sm:$0xff]  ;;  %v1705_v3 = vmov 0   ;;  %v442_v4 = vld [vmem:[%s2329_s2 + $0x8] sm:$0xff]  ;;  %v314_v6 = vld [vmem:[%s2328_s1 + $0x18] sm:$0xff]  ;;  %v2336_v23 = vmov 0.0   ;;  %s1410_s13 = sshll.u32 %s1779_s7, 3  ;;  %v337_v24 = vlaneseq }
  0x19   : > { %v311_v2 = vld [vmem:[%s2328_s1] sm:$0xff]  ;;  %1510 = vset.pattern.permute.xlu1 %v1705_v3  ;;  %1509 = vset.pattern.permute.xlu0 %v1705_v3  ;;  %v312_v5 = vld [vmem:[%s2328_s1 + $0x8] sm:$0xff]  ;;  %v313_v7 = vld [vmem:[%s2328_s1 + $0x10] sm:$0xff]  ;;  %p303_p10 = scmp.lt.s32.totalorder %s1410_s13, 23  ;;  %vm717_vm0 = vcmask 261120   ;;  %s299_s11 = sand.u32 1, %s1695_s30  }
  0x1a   : > { %447 = vperm.xlu1 %1510, %v441_v1   ;;  %317 = vperm.xlu0 %1509, %v311_v2   ;;  %v444_v8 = vld [vmem:[%s2329_s2 + $0x18] sm:$0xff]  ;;  %v443_v9 = vld [vmem:[%s2329_s2 + $0x10] sm:$0xff]  ;;  %v602_v10 = vld [vmem:[%s2330_s3 + $0x8] sm:$0xff]  ;;  %v1869_v25 = vshrl.u32 %v337_v24, 7 }
  0x1b   : > { %v601_v11 = vld [vmem:[%s2330_s3] sm:$0xff]  ;;  %v604_v12 = vld [vmem:[%s2330_s3 + $0x18] sm:$0xff]  ;;  %v603_v13 = vld [vmem:[%s2330_s3 + $0x10] sm:$0xff]  ;;  %794 = vmatprep.mubr.f32.mxu0 %v2336_v23  ;;  %883 = vmatprep.mubr.f32.mxu1 %v2336_v23  ;;  %s2359_s13 = smov (!%p303_p10, %s1410_s13), 23 }
  0x1c   : > { %v694_v14 = vld [vmem:[%s2332_s5 + $0x8] sm:$0xff]  ;;  %v693_v15 = vld [vmem:[%s2332_s5] sm:$0xff]  ;;  %v696_v16 = vld [vmem:[%s2332_s5 + $0x18] sm:$0xff]  ;;  %s1411_s14 = sshll.u32 %s2359_s13, 1  ;;  %2343 = vst [vmem:[#allocation6_spill] sm:$0xff] %v1869_v25  ;;  %v343_v26 = vsub.s32 2, %v1869_v25 }
  0x1d   : > { %v695_v17 = vld [vmem:[%s2332_s5 + $0x10] sm:$0xff]  ;;  %v1119_v18 = vld [vmem:[%s2333_s6 + $0x8] sm:$0xff]  ;;  %v1118_v19 = vld [vmem:[%s2333_s6] sm:$0xff]  ;;  %s1874_s20 = scalar_lea.vmem %s2327_s0, %s1411_s14  ;;  %v471_v27 = vsub.s32 3, %v1869_v25  ;;  %v351_v28 = vsub.s32 6, %v1869_v25  ;;  %v479_v29 = vsub.s32 7, %v1869_v25 }
  0x1e   : > { %452 = vperm.xlu1 %1510, %v442_v4   ;;  %322 = vperm.xlu0 %1509, %v312_v5   ;;  %v1121_v20 = vld [vmem:[%s2333_s6 + $0x18] sm:$0xff]  ;;  %v1120_v21 = vld [vmem:[%s2333_s6 + $0x10] sm:$0xff]  ;;  %v1246_v22 = vld [vmem:[#allocation2] sm:$0x1]  ;;  %v467_v30 = vsub.s32 1, %v1869_v25  ;;  %v475_v31 = vsub.s32 5, %v1869_v25 }
  0x1f   : > { %v1883_v32 = vsub.s32 0, %v1869_v25  ;;  %v347_v33 = vsub.s32 4, %v1869_v25  ;;  %v309_v34 = vld [vmem:[%s1874_s20] sm:$0xff]  ;;  %v310_v35 = vld [vmem:[%s1874_s20 + $0x8] sm:$0xff]  ;;  %s1409_s13 = sshll.u32 %s299_s11, 3  ;;  %s1433_s14 = sshll.u32 %s1779_s7, 7 }
  0x20   : > { %v344_v36 = vrot.slane %v309_v34, %v343_v26  ;;  %v472_v37 = vrot.slane %v309_v34, %v471_v27  ;;  %v352_v38 = vrot.slane %v309_v34, %v351_v28  ;;  %v480_v39 = vrot.slane %v309_v34, %v479_v29  ;;  %s301_s18 = scalar_lea.vmem [#allocation3], %s1409_s13  ;;  %s2285_s23 = scalar_lea.hbm %s2335_s8, %s1433_s14 }
  0x21   : > { %2344 = vst [vmem:[#allocation7_spill] sm:$0xff] %v1883_v32  ;;  %v484_v40 = vrot.slane %v310_v35, %v467_v30  ;;  %v492_v41 = vrot.slane %v310_v35, %v475_v31  ;;  %v356_v42 = vrot.slane %v310_v35, %v1883_v32  ;;  %v364_v43 = vrot.slane %v310_v35, %v347_v33  ;;  %s1346_s19 = sshll.u32 %s301_s18, 4  ;;  %s1709_s7 = smov [#allocation3]   ;;  %s2287_s19 = int_to_ptr.vmem [resolvable:$true] %s1346_s19 }
  0x22   : > { %332 = vperm.xlu1 %1510, %v314_v6   ;;  %327 = vperm.xlu0 %1509, %v313_v7   ;;  %v340_v44 = vrot.slane %v309_v34, %v1883_v32  ;;  %v468_v45 = vrot.slane %v309_v34, %v467_v30  ;;  %v348_v46 = vrot.slane %v309_v34, %v347_v33  ;;  %s1641_s24 = scalar_lea.vmem %s2287_s19, 128  ;;  %s1645_s25 = sshll.u32 %s1709_s7, 4  ;;  %s1646_s25 = int_to_ptr.vmem [resolvable:$false] %s1645_s25 }
  0x23   : > { %v476_v47 = vrot.slane %v309_v34, %v475_v31  ;;  %v360_v50 = vrot.slane %v310_v35, %v343_v26  ;;  %v488_v51 = vrot.slane %v310_v35, %v471_v27  ;;  %v368_v52 = vrot.slane %v310_v35, %v351_v28  ;;  %p1642_p11 = scmp.ne.s32.totalorder %s2287_s19, %s1641_s24  ;;  %s1647_s26 = scalar_lea.vmem %s1646_s25, 256 }
  0x24   : > { %v496_v53 = vrot.slane %v310_v35, %v479_v29  ;;  %v384_v54 = vrot.slane %v344_v36, %v1883_v32  ;;  %v1895_v55 = vrot.slane %v472_v37, %v467_v30  ;;  %v392_v56 = vrot.slane %v352_v38, %v1883_v32  ;;  %p1648_p0 = scmp.lt.s32.totalorder %s2287_s19, %s1646_s25  ;;  %p1649_p1 = scmp.lt.s32.totalorder %s1647_s26, %s1641_s24 }
  0x25   : > { %v1898_v57 = vrot.slane %v480_v39, %v467_v30  ;;  %v1900_v58 = vrot.slane %v484_v40, %v467_v30  ;;  %v1902_v59 = vrot.slane %v492_v41, %v467_v30  ;;  %v396_v60 = vrot.slane %v356_v42, %v1883_v32  ;;  %p1643_p12 = pnand %p1642_p11, %p1796_p5 }
  0x26   : > { %462 = vperm.xlu1 %1510, %v444_v8   ;;  %457 = vperm.xlu0 %1509, %v443_v9   ;;  %v1906_v61 = vrot.slane %v364_v43, %v1883_v32  ;;  %v380_v62 = vrot.slane %v340_v44, %v1883_v32  ;;  %v1909_v63 = vrot.slane %v468_v45, %v467_v30  ;;  %p1650_p2 = por %p1649_p1, %p1648_p0 }
  0x27   : > { %v388_v0 = vrot.slane %v348_v46, %v1883_v32  ;;  %v1912_v1 = vrot.slane %v476_v47, %v467_v30  ;;  %v1919_v4 = vrot.slane %v360_v50, %v1883_v32  ;;  %v1921_v5 = vrot.slane %v488_v51, %v467_v30  ;;  %p1644_p13 = pneg %p1643_p12 }
  0x28   : > { %v1924_v6 = vrot.slane %v368_v52, %v1883_v32  ;;  %v1926_v7 = vrot.slane %v496_v53, %v467_v30 }
  0x29   : > { %p1651_p3 = pnand %p1650_p2, %p1644_p13 }
  0x2a   : > { %612 = vperm.xlu1 %1510, %v602_v10   ;;  %607 = vperm.xlu0 %1509, %v601_v11  }
  0x2e   : > { %622 = vperm.xlu1 %1510, %v604_v12   ;;  %617 = vperm.xlu0 %1509, %v603_v13  }
  0x32   : > { %704 = vperm.xlu1 %1510, %v694_v14   ;;  %699 = vperm.xlu0 %1509, %v693_v15  }
  0x36   : > { %714 = vperm.xlu1 %1510, %v696_v16   ;;  %709 = vperm.xlu0 %1509, %v695_v17  }
  0x3a   : > { %1129 = vperm.xlu1 %1510, %v1119_v18   ;;  %1124 = vperm.xlu0 %1509, %v1118_v19  }
  0x3e   : > { %1139 = vperm.xlu1 %1510, %v1121_v20   ;;  %1134 = vperm.xlu0 %1509, %v1120_v21  }
  0x42   : > { %1249 = vperm.xlu0 %1509, %v1246_v22  }
  0x99   : > { %v1890_v48 = vpop.permute.xlu1 %447  ;;  %v1892_v49 = vpop.permute.xlu0 %317 }
  0x9a   : > { %v410_v8 = vmul.f32 %v384_v54, %v1892_v49  ;;  %v538_v9 = vmul.f32 %v1895_v55, %v1890_v48  ;;  %v412_v10 = vmul.f32 %v392_v56, %v1892_v49  ;;  %v540_v11 = vmul.f32 %v1898_v57, %v1890_v48 }
  0x9b   : > { %v1936_v12 = vmul.f32 %v1900_v58, %v1890_v48  ;;  %v1940_v13 = vmul.f32 %v1902_v59, %v1890_v48  ;;  %v1943_v14 = vmul.f32 %v396_v60, %v1892_v49  ;;  %v1947_v15 = vmul.f32 %v1906_v61, %v1892_v49 }
  0x9c   : > { %v409_v16 = vmul.f32 %v380_v62, %v1892_v49  ;;  %v537_v17 = vmul.f32 %v1909_v63, %v1890_v48  ;;  %v411_v18 = vmul.f32 %v388_v0, %v1892_v49  ;;  %v539_v19 = vmul.f32 %v1912_v1, %v1890_v48 }
  0x9d   : > { %v1914_v2 = vpop.permute.xlu1 %452  ;;  %v1916_v3 = vpop.permute.xlu0 %322  ;;  %v570_v28 = vadd.f32 %v538_v9, %v410_v8  ;;  %v572_v29 = vadd.f32 %v540_v11, %v412_v10  ;;  %v1973_v35 = vmul.f32 %v1919_v4, %v1892_v49  ;;  %v1977_v36 = vmul.f32 %v1921_v5, %v1890_v48 }
  0x9e   : > { %v418_v22 = vmul.f32 %v384_v54, %v1916_v3  ;;  %v546_v24 = vmul.f32 %v1895_v55, %v1914_v2  ;;  %v420_v26 = vmul.f32 %v392_v56, %v1916_v3  ;;  %v548_v27 = vmul.f32 %v1898_v57, %v1914_v2 }
  0x9f   : > { %v417_v30 = vmul.f32 %v380_v62, %v1916_v3  ;;  %v545_v31 = vmul.f32 %v1909_v63, %v1914_v2  ;;  %v419_v33 = vmul.f32 %v388_v0, %v1916_v3  ;;  %v547_v34 = vmul.f32 %v1912_v1, %v1914_v2 }
  0xa0   : > { %v1981_v37 = vmul.f32 %v1900_v58, %v1914_v2  ;;  %v1985_v38 = vmul.f32 %v1902_v59, %v1914_v2  ;;  %v1988_v39 = vmul.f32 %v396_v60, %v1916_v3  ;;  %v1992_v40 = vmul.f32 %v1906_v61, %v1916_v3 }
  0xa1   : > { %v1955_v20 = vpop.permute.xlu1 %332  ;;  %v1957_v21 = vpop.permute.xlu0 %327  ;;  %v578_v43 = vadd.f32 %v546_v24, %v418_v22  ;;  %v580_v44 = vadd.f32 %v548_v27, %v420_v26  ;;  %v569_v45 = vadd.f32 %v537_v17, %v409_v16  ;;  %v571_v46 = vadd.f32 %v539_v19, %v411_v18 }
  0xa2   : > { %v1999_v47 = vmul.f32 %v396_v60, %v1955_v20  ;;  %v2002_v50 = vmul.f32 %v396_v60, %v1957_v21  ;;  %v2006_v51 = vmul.f32 %v1906_v61, %v1957_v21  ;;  %v577_v52 = vadd.f32 %v545_v31, %v417_v30 }
  0xa3   : > { %v579_v53 = vadd.f32 %v547_v34, %v419_v33  ;;  %v426_v8 = vmul.f32 %v384_v54, %v1957_v21  ;;  %v434_v9 = vmul.f32 %v384_v54, %v1955_v20  ;;  %v428_v10 = vmul.f32 %v392_v56, %v1957_v21 }
  0xa4   : > { %2345 = vst [vmem:[#allocation8_spill] sm:$0xff] %v1999_v47  ;;  %2346 = vst [vmem:[#allocation9_spill] sm:$0xff] %v2006_v51  ;;  %v436_v11 = vmul.f32 %v392_v56, %v1955_v20  ;;  %v425_v16 = vmul.f32 %v380_v62, %v1957_v21  ;;  %v433_v17 = vmul.f32 %v380_v62, %v1955_v20 }
  0xa5   : > { %v1994_v41 = vpop.permute.xlu1 %462  ;;  %v1996_v42 = vpop.permute.xlu0 %457  ;;  %v427_v60 = vmul.f32 %v388_v0, %v1957_v21  ;;  %v435_v54 = vmul.f32 %v388_v0, %v1955_v20  ;;  %v422_v24 = vmul.f32 %v1919_v4, %v1916_v3  ;;  %v550_v56 = vmul.f32 %v1921_v5, %v1914_v2 }
  0xa6   : > { %v2017_v18 = vmul.f32 %v1900_v58, %v1994_v41  ;;  %v554_v30 = vmul.f32 %v1895_v55, %v1996_v42  ;;  %v2035_v31 = vmul.f32 %v1900_v58, %v1996_v42  ;;  %v562_v33 = vmul.f32 %v1895_v55, %v1994_v41 }
  0xa7   : > { %v556_v34 = vmul.f32 %v1898_v57, %v1996_v42  ;;  %v561_v55 = vmul.f32 %v1909_v63, %v1994_v41  ;;  %v563_v25 = vmul.f32 %v1912_v1, %v1994_v41 }
  0xa8   : > { %2347 = vst [vmem:[#allocation10_spill] sm:$0xff] %v2017_v18 }
  0xa9   : > { %v2019_v19 = vpop.permute.xlu1 %612  ;;  %v2021_v22 = vpop.permute.xlu0 %607  ;;  %v588_v51 = vadd.f32 %v556_v34, %v428_v10  ;;  %v595_v47 = vadd.f32 %v563_v25, %v435_v54  ;;  %v424_v25 = vmul.f32 %v1924_v6, %v1916_v3  ;;  %v581_v3 = vadd.f32 %v1981_v37, %v1988_v39 }
  0xaa   : > { %v626_v62 = vadd.f32 %v2021_v22, %v570_v28  ;;  %v634_v26 = vadd.f32 %v2019_v19, %v578_v43  ;;  %v628_v27 = vadd.f32 %v2021_v22, %v572_v29  ;;  %v636_v0 = vadd.f32 %v2019_v19, %v580_v44 }
  0xab   : > { %v625_v28 = vadd.f32 %v2021_v22, %v569_v45  ;;  %v564_v29 = vmul.f32 %v1898_v57, %v1994_v41  ;;  %v553_v43 = vmul.f32 %v1909_v63, %v1996_v42  ;;  %v633_v58 = vadd.f32 %v2019_v19, %v577_v52 }
  0xac   : > { %1511 = vtanh.f32 %v626_v62  ;;  %v555_v44 = vmul.f32 %v1912_v1, %v1996_v42  ;;  %v627_v45 = vadd.f32 %v2021_v22, %v571_v46  ;;  %v586_v57 = vadd.f32 %v554_v30, %v426_v8 }
  0xad   : > { %v2047_v23 = vpop.permute.xlu0 %617  ;;  %1513 = vtanh.f32 %v634_v26  ;;  %v2054_v62 = vpop.permute.xlu1 %622  ;;  %v2061_v26 = vmul.f32 %v1902_v59, %v1996_v42  ;;  %v635_v52 = vadd.f32 %v2019_v19, %v579_v53  ;;  %v594_v63 = vadd.f32 %v562_v33, %v434_v9 }
  0xae   : > { %1515 = vtanh.f32 %v628_v27  ;;  %v642_v32 = vadd.f32 %v2047_v23, %v586_v57  ;;  %v596_v18 = vadd.f32 %v564_v29, %v436_v11  ;;  %v585_v8 = vadd.f32 %v553_v43, %v425_v16 }
  0xaf   : > { %1517 = vtanh.f32 %v636_v0  ;;  %v650_v46 = vadd.f32 %v2054_v62, %v594_v63  ;;  %v593_v27 = vadd.f32 %v561_v55, %v433_v17  ;;  %v644_v1 = vadd.f32 %v2047_v23, %v588_v51 }
  0xb0   : > { %1519 = vtanh.f32 %v625_v28  ;;  %v587_v30 = vadd.f32 %v555_v44, %v427_v60  ;;  %v652_v0 = vadd.f32 %v2054_v62, %v596_v18  ;;  %v574_v53 = vadd.f32 %v1977_v36, %v1973_v35 }
  0xb1   : > { %1521 = vtanh.f32 %v633_v58  ;;  %v582_v9 = vadd.f32 %v550_v56, %v422_v24  ;;  %v641_v10 = vadd.f32 %v2047_v23, %v585_v8  ;;  %v416_v11 = vmul.f32 %v1924_v6, %v1892_v49 }
  0xb2   : > { %1523 = vtanh.f32 %v627_v45  ;;  %v544_v16 = vmul.f32 %v1926_v7, %v1890_v48  ;;  %v649_v51 = vadd.f32 %v2054_v62, %v593_v27  ;;  %v552_v17 = vmul.f32 %v1926_v7, %v1914_v2 }
  0xb3   : > { %1525 = vtanh.f32 %v635_v52  ;;  %v651_v36 = vadd.f32 %v2054_v62, %v595_v47  ;;  %v630_v49 = vadd.f32 %v2021_v22, %v574_v53  ;;  %v638_v48 = vadd.f32 %v2019_v19, %v582_v9 }
  0xb4   : > { %1527 = vtanh.f32 %v642_v32  ;;  %v643_v32 = vadd.f32 %v2047_v23, %v587_v30  ;;  %v573_v18 = vadd.f32 %v1936_v12, %v1943_v14  ;;  %v576_v24 = vadd.f32 %v544_v16, %v416_v11 }
  0xb5   : > { %1529 = vtanh.f32 %v650_v46  ;;  %v575_v56 = vadd.f32 %v1940_v13, %v1947_v15  ;;  %v584_v33 = vadd.f32 %v552_v17, %v424_v25  ;;  %v583_v28 = vadd.f32 %v1985_v38, %v1992_v40  ;;  %v2349_v17 = vld [vmem:[#allocation10_spill] sm:$0xff] }
  0xb6   : > { %v1512_v35 = vpop.eup %1511  ;;  %1531 = vtanh.f32 %v644_v1  ;;  %v629_v34 = vadd.f32 %v2021_v22, %v573_v18  ;;  %v632_v14 = vadd.f32 %v2021_v22, %v576_v24  ;;  %v558_v37 = vmul.f32 %v1921_v5, %v1996_v42 }
  0xb7   : > { %v1514_v60 = vpop.eup %1513  ;;  %1533 = vtanh.f32 %v652_v0  ;;  %v640_v13 = vadd.f32 %v2019_v19, %v584_v33  ;;  %v637_v15 = vadd.f32 %v2019_v19, %v581_v3  ;;  %v566_v43 = vmul.f32 %v1921_v5, %v1994_v41  ;;  %v2133_v3 = vld [vmem:[%s2331_s4] sm:$0xff] }
  0xb8   : > { %v1516_v54 = vpop.eup %1515  ;;  %v1434_v2 = vpack.c.bf16 %v1514_v60, %v1512_v35  ;;  %1535 = vtanh.f32 %v641_v10  ;;  %v430_v40 = vmul.f32 %v1919_v4, %v1957_v21  ;;  %v560_v55 = vmul.f32 %v1926_v7, %v1996_v42  ;;  %v2350_v60 = vld [vmem:[#allocation9_spill] sm:$0xff] }
  0xb9   : > { %v1518_v47 = vpop.eup %1517  ;;  %1537 = vtanh.f32 %v649_v51  ;;  %v631_v45 = vadd.f32 %v2021_v22, %v575_v56  ;;  %v438_v57 = vmul.f32 %v1919_v4, %v1955_v20  ;;  %v568_v5 = vmul.f32 %v1926_v7, %v1994_v41 }
  0xba   : > { %v1520_v29 = vpop.eup %1519  ;;  %1435 = vmatprep.subr.bf16.mxu0 %v1434_v2  ;;  %v1442_v12 = vpack.c.bf16 %v1518_v47, %v1516_v54  ;;  %1539 = vtanh.f32 %v643_v32  ;;  %v590_v46 = vadd.f32 %v558_v37, %v430_v40  ;;  %v432_v8 = vmul.f32 %v1924_v6, %v1957_v21 }
  0xbb   : > { %v1522_v39 = vpop.eup %1521  ;;  %1541 = vtanh.f32 %v651_v36  ;;  %v639_v42 = vadd.f32 %v2019_v19, %v583_v28  ;;  %v598_v1 = vadd.f32 %v566_v43, %v438_v57  ;;  %v440_v22 = vmul.f32 %v1924_v6, %v1955_v20 }
  0xbc   : > { %v1524_v58 = vpop.eup %1523  ;;  %1443 = vmatprep.subr.bf16.mxu1 %v1442_v12  ;;  %v1436_v38 = vpack.c.bf16 %v1522_v39, %v1520_v29  ;;  %1543 = vtanh.f32 %v630_v49  ;;  %v646_v7 = vadd.f32 %v2047_v23, %v590_v46  ;;  %v592_v0 = vadd.f32 %v560_v55, %v432_v8  ;;  %v2180_v46 = vpop.permute.xlu0 %699 }
  0xbd   : > { %v1526_v44 = vpop.eup %1525  ;;  %1545 = vtanh.f32 %v638_v48  ;;  %v567_v9 = vmul.f32 %v1902_v59, %v1994_v41  ;;  %v654_v21 = vadd.f32 %v2054_v62, %v598_v1  ;;  %v600_v10 = vadd.f32 %v568_v5, %v440_v22  ;;  %v2348_v41 = vld [vmem:[#allocation8_spill] sm:$0xff] }
  0xbe   : > { %v1528_v52 = vpop.eup %1527  ;;  %1437 = vmatpush1.bf16.msra.mxu0 %v1436_v38  ;;  %v1444_v63 = vpack.c.bf16 %v1526_v44, %v1524_v58  ;;  %1547 = vtanh.f32 %v632_v14  ;;  %v648_v6 = vadd.f32 %v2047_v23, %v592_v0  ;;  %v589_v16 = vadd.f32 %v2035_v31, %v2002_v50  ;;  %v692_v44 = vld [vmem:[%s2331_s4 + $0x18] sm:$0xff] }
  0xbf   : > { %v1530_v27 = vpop.eup %1529  ;;  %1549 = vtanh.f32 %v640_v13  ;;  %v439_v25 = vmul.f32 %v1906_v61, %v1955_v20  ;;  %v656_v59 = vadd.f32 %v2054_v62, %v600_v10  ;;  %v597_v35 = vadd.f32 %v2349_v17, %v2348_v41  ;;  %v691_v13 = vld [vmem:[%s2331_s4 + $0x10] sm:$0xff] }
  0xc0   : > { %v1532_v4 = vpop.eup %1531  ;;  %1445 = vmatpush1.bf16.msra.mxu1 %v1444_v63  ;;  %v1438_v30 = vpack.c.bf16 %v1530_v27, %v1528_v52  ;;  %1551 = vtanh.f32 %v629_v34  ;;  %v645_v49 = vadd.f32 %v2047_v23, %v589_v16  ;;  %v591_v48 = vadd.f32 %v2061_v26, %v2350_v60  ;;  %v2182_v8 = vpop.permute.xlu0 %709 }
  0xc1   : > { %v1534_v53 = vpop.eup %1533  ;;  %1553 = vtanh.f32 %v637_v15  ;;  %v653_v31 = vadd.f32 %v2054_v62, %v597_v35  ;;  %v599_v61 = vadd.f32 %v567_v9, %v439_v25  ;;  %v2351_v28 = vmov 0.0  }
  0xc2   : > { %v1536_v19 = vpop.eup %1535  ;;  %1439 = vmatprep.subr.bf16.mxu0 %v1438_v30  ;;  %v1446_v11 = vpack.c.bf16 %v1534_v53, %v1532_v4  ;;  %1555 = vtanh.f32 %v631_v45  ;;  %v647_v54 = vadd.f32 %v2047_v23, %v591_v48  ;;  %v690_v23 = vld [vmem:[%s2331_s4 + $0x8] sm:$0xff]  ;;  %v2189_v53 = vpop.permute.xlu1 %704 }
  0xc3   : > { %v1538_v51 = vpop.eup %1537  ;;  %1557 = vtanh.f32 %v639_v42  ;;  %v655_v26 = vadd.f32 %v2054_v62, %v599_v61  ;;  %v1707_v61 = vmov 1983009808  }
  0xc4   : > { %v1540_v32 = vpop.eup %1539  ;;  %1447 = vmatprep.subr.bf16.mxu1 %v1446_v11  ;;  %v1440_v36 = vpack.c.bf16 %v1538_v51, %v1536_v19  ;;  %1559 = vtanh.f32 %v646_v7  ;;  %v2184_v42 = vpop.permute.xlu0 %1124 }
  0xc5   : > { %v1542_v50 = vpop.eup %1541  ;;  %1561 = vtanh.f32 %v654_v21 }
  0xc6   : > { %v1544_v20 = vpop.eup %1543  ;;  %1441 = vmatpush1.bf16.msra.mxu0 %v1440_v36  ;;  %v1448_v18 = vpack.c.bf16 %v1542_v50, %v1540_v32  ;;  %1563 = vtanh.f32 %v648_v6 }
  0xc7   : > { %v1546_v2 = vpop.eup %1545  ;;  %1565 = vtanh.f32 %v656_v59 }
  0xc8   : > { %v1548_v24 = vpop.eup %1547  ;;  %1449 = vmatpush1.bf16.msra.mxu1 %v1448_v18  ;;  %v1450_v56 = vpack.c.bf16 %v1546_v2, %v1544_v20  ;;  %1567 = vtanh.f32 %v645_v49  ;;  %v2194_v16 = vpop.permute.xlu0 %1134  ;;  %v2204_v20 = vunpack.c.l.s4 %v1707_v61 }
  0xc9   : > { %v1550_v47 = vpop.eup %1549  ;;  %1412 = vmatmul.mubr.msk.f32.vlgmr.msra.gmra.mrb[0].mxu0 %vm717_vm0, %v2133_v3  ;;  %1569 = vtanh.f32 %v653_v31  ;;  %v2200_v49 = vpop.permute.xlu1 %714 }
  0xca   : > { %v1552_v33 = vpop.eup %1551  ;;  %1451 = vmatprep.subr.bf16.mxu0 %v1450_v56  ;;  %v1458_v34 = vpack.c.bf16 %v1550_v47, %v1548_v24  ;;  %800 = vmatprep.mubr.f32.mxu0 %v2351_v28  ;;  %1571 = vtanh.f32 %v647_v54 }
  0xcb   : > { %v1554_v62 = vpop.eup %1553  ;;  %1416 = vmatmul.mubr.msk.f32.vlgmr.msra.gmra.mrb[0].mxu1 %vm717_vm0, %v2133_v3  ;;  %1573 = vtanh.f32 %v655_v26 }
  0xcc   : > { %v1556_v29 = vpop.eup %1555  ;;  %1459 = vmatprep.subr.bf16.mxu1 %v1458_v34  ;;  %v1452_v12 = vpack.c.bf16 %v1554_v62, %v1552_v33  ;;  %889 = vmatprep.mubr.f32.mxu1 %v2351_v28 }
  0xcd   : > { %v1558_v14 = vpop.eup %1557  ;;  %1413 = vmatmul.mubr.msk.f32.gmra.mrb[2].mxu0 %vm717_vm0, %v690_v23 }
  0xce   : > { %v1560_v37 = vpop.eup %1559  ;;  %1453 = vmatpush1.bf16.msra.mxu0 %v1452_v12  ;;  %v1460_v39 = vpack.c.bf16 %v1558_v14, %v1556_v29  ;;  %806 = vmatprep.mubr.f32.mxu0 %v2351_v28  ;;  %v1276_v14 = vunpack.c.0.s8 %v2204_v20 }
  0xcf   : > { %v1562_v15 = vpop.eup %1561  ;;  %1417 = vmatmul.mubr.msk.f32.gmra.mrb[2].mxu1 %vm717_vm0, %v690_v23 }
  0xd0   : > { %v1564_v43 = vpop.eup %1563  ;;  %1461 = vmatpush1.bf16.msra.mxu1 %v1460_v39  ;;  %v1454_v58 = vpack.c.bf16 %v1562_v15, %v1560_v37  ;;  %895 = vmatprep.mubr.f32.mxu1 %v2351_v28  ;;  %v2214_v39 = vpop.permute.xlu1 %1129 }
  0xd1   : > { %v1566_v38 = vpop.eup %1565  ;;  %1414 = vmatmul.mubr.msk.f32.gmra.mrb[4].mxu0 %vm717_vm0, %v691_v13 }
  0xd2   : > { %v1568_v40 = vpop.eup %1567  ;;  %1455 = vmatprep.subr.bf16.mxu0 %v1454_v58  ;;  %v1462_v55 = vpack.c.bf16 %v1566_v38, %v1564_v43  ;;  %812 = vmatprep.mubr.f32.mxu0 %v2351_v28 }
  0xd3   : > { %v1570_v45 = vpop.eup %1569  ;;  %1418 = vmatmul.mubr.msk.f32.gmra.mrb[4].mxu1 %vm717_vm0, %v691_v13 }
  0xd4   : > { %v1572_v57 = vpop.eup %1571  ;;  %1463 = vmatprep.subr.bf16.mxu1 %v1462_v55  ;;  %v1456_v5 = vpack.c.bf16 %v1570_v45, %v1568_v40  ;;  %901 = vmatprep.mubr.f32.mxu1 %v2351_v28 }
  0xd5   : > { %v1574_v52 = vpop.eup %1573  ;;  %1415 = vmatmul.mubr.msk.f32.gmra.mrb[6].mxu0 %vm717_vm0, %v692_v44 }
  0xd6   : > { %1457 = vmatpush1.bf16.msra.mxu0 %v1456_v5  ;;  %v1464_v63 = vpack.c.bf16 %v1574_v52, %v1572_v57  ;;  %972 = vmatprep.mubr.f32.mxu0 %v2351_v28 }
  0xd7   : > { %1419 = vmatmul.mubr.msk.f32.gmra.mrb[6].mxu1 %vm717_vm0, %v692_v44 }
  0xd8   : > { %1465 = vmatpush1.bf16.msra.mxu1 %v1464_v63  ;;  %1061 = vmatprep.mubr.f32.mxu1 %v2351_v28 }
  0xd9   : > { %1420 = vmatmul.mubr.msk.f32.vlgmr.msra.gmra.mrb[8].mxu0 %vm717_vm0, %v2133_v3 }
  0xda   : > { %978 = vmatprep.mubr.f32.mxu0 %v2351_v28 }
  0xdb   : > { %1424 = vmatmul.mubr.msk.f32.vlgmr.msra.gmra.mrb[8].mxu1 %vm717_vm0, %v2133_v3  ;;  %v1250_v3 = vpop.permute.xlu0 %1249 }
  0xdc   : > { %1067 = vmatprep.mubr.f32.mxu1 %v2351_v28 }
  0xdd   : > { %1421 = vmatmul.mubr.msk.f32.gmra.mrb[10].mxu0 %vm717_vm0, %v690_v23 }
  0xde   : > { %984 = vmatprep.mubr.f32.mxu0 %v2351_v28 }
  0xdf   : > { %1425 = vmatmul.mubr.msk.f32.gmra.mrb[10].mxu1 %vm717_vm0, %v690_v23  ;;  %v2352_v23 = vld [vmem:[#allocation7_spill] sm:$0xff] }
  0xe0   : > { %1073 = vmatprep.mubr.f32.mxu1 %v2351_v28  ;;  %v2210_v62 = vrot.slane %v1250_v3, %v2352_v23 }
  0xe1   : > { %1422 = vmatmul.mubr.msk.f32.gmra.mrb[12].mxu0 %vm717_vm0, %v691_v13 }
  0xe2   : > { %990 = vmatprep.mubr.f32.mxu0 %v2351_v28 }
  0xe3   : > { %1426 = vmatmul.mubr.msk.f32.gmra.mrb[12].mxu1 %vm717_vm0, %v691_v13 }
  0xe4   : > { %1079 = vmatprep.mubr.f32.mxu1 %v2351_v28 }
  0xe5   : > { %1423 = vmatmul.mubr.msk.f32.gmra.mrb[14].mxu0 %vm717_vm0, %v692_v44 }
  0xe7   : > { %1427 = vmatmul.mubr.msk.f32.gmra.mrb[14].mxu1 %vm717_vm0, %v692_v44 }
 0x19c   : > { %v796_v27 = vpop.f32.mrb[0].mxu0 }
 0x19d   : > { %v797_v1 = vadd.f32 %v796_v27, %v2180_v46  ;;  %v798_v22 = vpop.f32.mrb[1].mxu0 }
 0x19e   : > { %v885_v4 = vpop.f32.mrb[0].mxu1  ;;  %v799_v30 = vadd.f32 %v798_v22, %v2180_v46 }
 0x19f   : > { %1575 = vtanh.f32 %v797_v1  ;;  %v886_v7 = vadd.f32 %v885_v4, %v2180_v46  ;;  %v887_v0 = vpop.f32.mrb[1].mxu1 }
 0x1a0   : > { %1577 = vtanh.f32 %v799_v30  ;;  %v888_v9 = vadd.f32 %v887_v0, %v2180_v46  ;;  %v802_v21 = vpop.f32.mrb[2].mxu0 }
 0x1a1   : > { %1579 = vtanh.f32 %v886_v7  ;;  %v803_v10 = vadd.f32 %v802_v21, %v2189_v53  ;;  %v804_v19 = vpop.f32.mrb[3].mxu0 }
 0x1a2   : > { %1581 = vtanh.f32 %v888_v9  ;;  %v891_v11 = vpop.f32.mrb[2].mxu1  ;;  %v805_v6 = vadd.f32 %v804_v19, %v2189_v53 }
 0x1a3   : > { %1583 = vtanh.f32 %v803_v10  ;;  %v892_v51 = vadd.f32 %v891_v11, %v2189_v53  ;;  %v893_v25 = vpop.f32.mrb[3].mxu1 }
 0x1a4   : > { %1585 = vtanh.f32 %v805_v6  ;;  %v894_v59 = vadd.f32 %v893_v25, %v2189_v53  ;;  %v808_v41 = vpop.f32.mrb[4].mxu0 }
 0x1a5   : > { %1587 = vtanh.f32 %v892_v51  ;;  %v809_v17 = vadd.f32 %v808_v41, %v2182_v8  ;;  %v810_v35 = vpop.f32.mrb[5].mxu0 }
 0x1a6   : > { %1589 = vtanh.f32 %v894_v59  ;;  %v897_v32 = vpop.f32.mrb[4].mxu1  ;;  %v811_v36 = vadd.f32 %v810_v35, %v2182_v8 }
 0x1a7   : > { %1591 = vtanh.f32 %v809_v17  ;;  %v898_v60 = vadd.f32 %v897_v32, %v2182_v8  ;;  %v899_v48 = vpop.f32.mrb[5].mxu1 }
 0x1a8   : > { %1593 = vtanh.f32 %v811_v36  ;;  %v900_v50 = vadd.f32 %v899_v48, %v2182_v8  ;;  %v814_v31 = vpop.f32.mrb[6].mxu0 }
 0x1a9   : > { %v1576_v18 = vpop.eup %1575  ;;  %1595 = vtanh.f32 %v898_v60  ;;  %v815_v54 = vadd.f32 %v814_v31, %v2200_v49  ;;  %v816_v2 = vpop.f32.mrb[7].mxu0 }
 0x1aa   : > { %v1578_v26 = vpop.eup %1577  ;;  %1597 = vtanh.f32 %v900_v50  ;;  %v903_v24 = vpop.f32.mrb[6].mxu1  ;;  %v817_v56 = vadd.f32 %v816_v2, %v2200_v49  ;;  %v1142_v13 = vmul.f32 %v1576_v18, %v2184_v42 }
 0x1ab   : > { %v1580_v47 = vpop.eup %1579  ;;  %1599 = vtanh.f32 %v815_v54  ;;  %v904_v33 = vadd.f32 %v903_v24, %v2200_v49  ;;  %v905_v34 = vpop.f32.mrb[7].mxu1  ;;  %v1143_v15 = vmul.f32 %v1578_v26, %v2184_v42 }
 0x1ac   : > { %v1582_v28 = vpop.eup %1581  ;;  %1601 = vtanh.f32 %v817_v56  ;;  %v906_v29 = vadd.f32 %v905_v34, %v2200_v49  ;;  %v974_v12 = vpop.f32.mrb[8].mxu0  ;;  %v1144_v40 = vmul.f32 %v1580_v47, %v2184_v42 }
 0x1ad   : > { %v1584_v37 = vpop.eup %1583  ;;  %1603 = vtanh.f32 %v904_v33  ;;  %v975_v43 = vadd.f32 %v974_v12, %v2180_v46  ;;  %v976_v58 = vpop.f32.mrb[9].mxu0  ;;  %v1145_v5 = vmul.f32 %v1582_v28, %v2184_v42 }
 0x1ae   : > { %v1586_v38 = vpop.eup %1585  ;;  %v1150_v55 = vmul.f32 %v1584_v37, %v2214_v39  ;;  %1605 = vtanh.f32 %v906_v29  ;;  %v1063_v44 = vpop.f32.mrb[8].mxu1  ;;  %v977_v45 = vadd.f32 %v976_v58, %v2180_v46 }
 0x1af   : > { %v1588_v57 = vpop.eup %1587  ;;  %v1151_v52 = vmul.f32 %v1586_v38, %v2214_v39  ;;  %1607 = vtanh.f32 %v975_v43  ;;  %v1064_v63 = vadd.f32 %v1063_v44, %v2180_v46  ;;  %v1065_v27 = vpop.f32.mrb[9].mxu1 }
 0x1b0   : > { %v1590_v1 = vpop.eup %1589  ;;  %v1174_v22 = vadd.f32 %v1150_v55, %v1142_v13  ;;  %v1152_v4 = vmul.f32 %v1588_v57, %v2214_v39  ;;  %1609 = vtanh.f32 %v977_v45  ;;  %v1066_v30 = vadd.f32 %v1065_v27, %v2180_v46  ;;  %v980_v7 = vpop.f32.mrb[10].mxu0 }
 0x1b1   : > { %v1592_v0 = vpop.eup %1591  ;;  %v1183_v9 = vadd.f32 %v1151_v52, %v1143_v15  ;;  %v1153_v21 = vmul.f32 %v1590_v1, %v2214_v39  ;;  %1611 = vtanh.f32 %v1064_v63  ;;  %v981_v10 = vadd.f32 %v980_v7, %v2189_v53  ;;  %v982_v19 = vpop.f32.mrb[11].mxu0 }
 0x1b2   : > { %v1594_v11 = vpop.eup %1593  ;;  %v1192_v6 = vadd.f32 %v1152_v4, %v1144_v40  ;;  %v1158_v51 = vmul.f32 %v1592_v0, %v2194_v16  ;;  %1613 = vtanh.f32 %v1066_v30  ;;  %v1069_v25 = vpop.f32.mrb[10].mxu1  ;;  %v983_v59 = vadd.f32 %v982_v19, %v2189_v53 }
 0x1b3   : > { %v1596_v41 = vpop.eup %1595  ;;  %v1201_v17 = vadd.f32 %v1153_v21, %v1145_v5  ;;  %v1159_v46 = vmul.f32 %v1594_v11, %v2194_v16  ;;  %1615 = vtanh.f32 %v981_v10  ;;  %v1070_v35 = vadd.f32 %v1069_v25, %v2189_v53  ;;  %v1071_v32 = vpop.f32.mrb[11].mxu1 }
 0x1b4   : > { %v1598_v36 = vpop.eup %1597  ;;  %v1175_v60 = vadd.f32 %v1174_v22, %v1158_v51  ;;  %v1160_v48 = vmul.f32 %v1596_v41, %v2194_v16  ;;  %1617 = vtanh.f32 %v983_v59  ;;  %v1072_v50 = vadd.f32 %v1071_v32, %v2189_v53  ;;  %v986_v31 = vpop.f32.mrb[12].mxu0 }
 0x1b5   : > { %v1600_v61 = vpop.eup %1599  ;;  %v2235_v18 = vpop.permute.xlu1 %1139  ;;  %v1184_v3 = vadd.f32 %v1183_v9, %v1159_v46  ;;  %v1161_v54 = vmul.f32 %v1598_v36, %v2194_v16  ;;  %1619 = vtanh.f32 %v1070_v35  ;;  %v987_v2 = vadd.f32 %v986_v31, %v2182_v8 }
 0x1b6   : > { %v988_v26 = vpop.f32.mrb[13].mxu0  ;;  %v1602_v24 = vpop.eup %1601  ;;  %v1193_v56 = vadd.f32 %v1192_v6, %v1160_v48  ;;  %v1166_v47 = vmul.f32 %v1600_v61, %v2235_v18  ;;  %1621 = vtanh.f32 %v1072_v50 }
 0x1b7   : > { %v1075_v33 = vpop.f32.mrb[12].mxu1  ;;  %v989_v34 = vadd.f32 %v988_v26, %v2182_v8  ;;  %v1604_v53 = vpop.eup %1603  ;;  %v1202_v28 = vadd.f32 %v1201_v17, %v1161_v54  ;;  %v1167_v23 = vmul.f32 %v1602_v24, %v2235_v18  ;;  %1623 = vtanh.f32 %v987_v2 }
 0x1b8   : > { %v1076_v29 = vadd.f32 %v1075_v33, %v2182_v8  ;;  %v1077_v12 = vpop.f32.mrb[13].mxu1  ;;  %v1606_v37 = vpop.eup %1605  ;;  %v1176_v13 = vadd.f32 %v1175_v60, %v1166_v47  ;;  %v1168_v15 = vmul.f32 %v1604_v53, %v2235_v18 }
 0x1b9   : > { %1625 = vtanh.f32 %v989_v34  ;;  %v1078_v43 = vadd.f32 %v1077_v12, %v2182_v8  ;;  %v992_v58 = vpop.f32.mrb[14].mxu0  ;;  %v1608_v38 = vpop.eup %1607  ;;  %v1185_v40 = vadd.f32 %v1184_v3, %v1167_v23  ;;  %v1169_v55 = vmul.f32 %v1606_v37, %v2235_v18 }
 0x1ba   : > { %1627 = vtanh.f32 %v1076_v29  ;;  %v993_v44 = vadd.f32 %v992_v58, %v2200_v49  ;;  %v994_v45 = vpop.f32.mrb[15].mxu0  ;;  %v1610_v57 = vpop.eup %1609  ;;  %v1177_v5 = vrot.slane %v1176_v13, 4  ;;  %v1194_v52 = vadd.f32 %v1193_v56, %v1168_v15 }
 0x1bb   : > { %v1146_v63 = vmul.f32 %v1608_v38, %v2184_v42  ;;  %1629 = vtanh.f32 %v1078_v43  ;;  %v1081_v27 = vpop.f32.mrb[14].mxu1  ;;  %v1612_v1 = vpop.eup %1611  ;;  %v1186_v22 = vrot.slane %v1185_v40, 4  ;;  %v1203_v4 = vadd.f32 %v1202_v28, %v1169_v55 }
 0x1bc   : > { %v1147_v8 = vmul.f32 %v1610_v57, %v2184_v42  ;;  %1631 = vtanh.f32 %v993_v44  ;;  %v1083_v30 = vpop.f32.mrb[15].mxu1  ;;  %v1614_v7 = vpop.eup %1613  ;;  %v1178_v0 = vadd.f32 %v1177_v5, %v1176_v13  ;;  %v1195_v9 = vrot.slane %v1194_v52, 4 }
 0x1bd   : > { %v1148_v21 = vmul.f32 %v1612_v1, %v2184_v42  ;;  %v1082_v10 = vadd.f32 %v1081_v27, %v2200_v49  ;;  %v1616_v19 = vpop.eup %1615  ;;  %v1187_v11 = vadd.f32 %v1186_v22, %v1185_v40  ;;  %v1204_v6 = vrot.slane %v1203_v4, 4 }
 0x1be   : > { %v1149_v51 = vmul.f32 %v1614_v7, %v2184_v42  ;;  %v995_v25 = vadd.f32 %v994_v45, %v2200_v49  ;;  %v1618_v59 = vpop.eup %1617  ;;  %v1179_v41 = vrot.slane %v1178_v0, 2  ;;  %v1196_v17 = vadd.f32 %v1195_v9, %v1194_v52 }
 0x1bf   : > { %v1154_v46 = vmul.f32 %v1616_v19, %v2214_v39  ;;  %1633 = vtanh.f32 %v1082_v10  ;;  %v1620_v35 = vpop.eup %1619  ;;  %v1188_v32 = vrot.slane %v1187_v11, 2  ;;  %v1205_v36 = vadd.f32 %v1204_v6, %v1203_v4 }
 0x1c0   : > { %v1155_v60 = vmul.f32 %v1618_v59, %v2214_v39  ;;  %1635 = vtanh.f32 %v995_v25  ;;  %v1622_v48 = vpop.eup %1621  ;;  %v1180_v50 = vadd.f32 %v1179_v41, %v1178_v0  ;;  %v1197_v31 = vrot.slane %v1196_v17, 2 }
 0x1c1   : > { %v1210_v61 = vadd.f32 %v1154_v46, %v1146_v63  ;;  %v1156_v42 = vmul.f32 %v1620_v35, %v2214_v39  ;;  %v1624_v3 = vpop.eup %1623  ;;  %v1189_v54 = vadd.f32 %v1188_v32, %v1187_v11  ;;  %v1206_v2 = vrot.slane %v1205_v36, 2 }
 0x1c2   : > { %v1219_v26 = vadd.f32 %v1155_v60, %v1147_v8  ;;  %v1157_v24 = vmul.f32 %v1622_v48, %v2214_v39  ;;  %v1181_v47 = vrot.slane %v1180_v50, 1  ;;  %v1198_v33 = vadd.f32 %v1197_v31, %v1196_v17 }
 0x1c3   : > { %v1626_v56 = vpop.eup %1625  ;;  %v1228_v34 = vadd.f32 %v1156_v42, %v1148_v21  ;;  %v1162_v53 = vmul.f32 %v1624_v3, %v2194_v16  ;;  %v1190_v23 = vrot.slane %v1189_v54, 1  ;;  %v1207_v29 = vadd.f32 %v1206_v2, %v1205_v36 }
 0x1c4   : > { %v1628_v28 = vpop.eup %1627  ;;  %v1237_v12 = vadd.f32 %v1157_v24, %v1149_v51  ;;  %v1163_v37 = vmul.f32 %v1626_v56, %v2194_v16  ;;  %v1199_v15 = vrot.slane %v1198_v33, 1  ;;  %v1084_v38 = vadd.f32 %v1083_v30, %v2200_v49  ;;  %v2353_v30 = vld [vmem:[#allocation6_spill] sm:$0xff] }
 0x1c5   : > { %v1630_v13 = vpop.eup %1629  ;;  %v1211_v43 = vadd.f32 %v1210_v61, %v1162_v53  ;;  %v1164_v58 = vmul.f32 %v1628_v28, %v2194_v16  ;;  %v1208_v40 = vrot.slane %v1207_v29, 1  ;;  %v1182_v45 = vadd.f32 %v1181_v47, %v1180_v50 }
 0x1c6   : > { %v1632_v39 = vpop.eup %1631  ;;  %v1220_v55 = vadd.f32 %v1219_v26, %v1163_v37  ;;  %v1165_v44 = vmul.f32 %v1630_v13, %v2194_v16  ;;  %1637 = vtanh.f32 %v1084_v38  ;;  %v1191_v52 = vadd.f32 %v1190_v23, %v1189_v54 }
 0x1c7   : > { %v1229_v57 = vadd.f32 %v1228_v34, %v1164_v58  ;;  %v1170_v5 = vmul.f32 %v1632_v39, %v2235_v18  ;;  %v1200_v27 = vadd.f32 %v1199_v15, %v1198_v33  ;;  %v1209_v1 = vadd.f32 %v1208_v40, %v1207_v29 }
 0x1c8   : > { %v1238_v63 = vadd.f32 %v1237_v12, %v1165_v44  ;;  %v1256_v22 = vadd.f32 %v2210_v62, %v1182_v45  ;;  %v1257_v49 = vadd.f32 %v2210_v62, %v1191_v52  ;;  %v1279_v7 = vsub.s32 %v1276_v14, %v2353_v30  ;;  %v1639_v44 = vld [vmem:[%s1874_s20] sm:$0xff]  ;;  %v1640_v52 = vld [vmem:[%s1874_s20 + $0x8] sm:$0xff]  ;;  %s1332_s20 = scalar_lea.sflag [#allocation4], %s299_s11 }
 0x1c9   : > { %v1634_v4 = vpop.eup %1633  ;;  %v1212_v8 = vadd.f32 %v1211_v43, %v1170_v5  ;;  %v1258_v9 = vadd.f32 %v2210_v62, %v1200_v27  ;;  %v1259_v21 = vadd.f32 %v2210_v62, %v1209_v1  ;;  %v1708_v58 = vmov 1966171168  }
 0x1ca   : > { %v1636_v16 = vpop.eup %1635  ;;  %v1172_v0 = vmul.f32 %v1634_v4, %v2235_v18  ;;  %v1272_v11 = vcombine.low %v1256_v22, %v1257_v49  ;;  %v1315_v38 = vunpack.c.l.s4 %v1708_v58 }
 0x1cb   : > { %v1213_v10 = vrot.slane %v1212_v8, 4  ;;  %v1171_v19 = vmul.f32 %v1636_v16, %v2235_v18  ;;  %v1273_v51 = vcombine.low %v1258_v9, %v1259_v21 }
 0x1cc   : > { %v1230_v6 = vadd.f32 %v1229_v57, %v1172_v0  ;;  %v1280_v41 = vrot.slane %v1272_v11, %v1279_v7  ;;  %v1316_v57 = vunpack.c.0.s8 %v1315_v38 }
 0x1cd   : > { %v1214_v25 = vadd.f32 %v1213_v10, %v1212_v8  ;;  %v1221_v59 = vadd.f32 %v1220_v55, %v1171_v19  ;;  %v1287_v46 = vrot.slane %v1273_v51, %v1279_v7 }
 0x1ce   : > { %v1231_v17 = vrot.slane %v1230_v6, 4  ;;  %v1319_v1 = vsub.s32 %v1316_v57, %v2353_v30 }
 0x1cf   : > { %v1215_v20 = vrot.slane %v1214_v25, 2  ;;  %v1222_v14 = vrot.slane %v1221_v59, 4  ;;  %v1288_v32 = vcombine.low %v1280_v41, %v1287_v46 }
 0x1d0   : > { %v1232_v35 = vadd.f32 %v1231_v17, %v1230_v6  ;;  %v1638_v36 = vpop.eup %1637 }
 0x1d1   : > { %v1216_v60 = vadd.f32 %v1215_v20, %v1214_v25  ;;  %v1223_v48 = vadd.f32 %v1222_v14, %v1221_v59  ;;  %v1173_v31 = vmul.f32 %v1638_v36, %v2235_v18  ;;  %v1308_v45 = vmul.f32 %v1639_v44, %v1288_v32 }
 0x1d2   : > { %v1233_v50 = vrot.slane %v1232_v35, 2 }
 0x1d3   : > { %v1217_v61 = vrot.slane %v1216_v60, 1  ;;  %v1224_v42 = vrot.slane %v1223_v48, 2  ;;  %v1239_v54 = vadd.f32 %v1238_v63, %v1173_v31  ;;  %v1310_v27 = vmul.f32 0.027777778, %v1308_v45 }
 0x1d4   : > { %v1234_v3 = vadd.f32 %v1233_v50, %v1232_v35 }
 0x1d5   : > { %v1225_v2 = vadd.f32 %v1224_v42, %v1223_v48  ;;  %v1218_v26 = vadd.f32 %v1217_v61, %v1216_v60  ;;  %v1240_v24 = vrot.slane %v1239_v54, 4 }
 0x1d6   : > { %v1235_v47 = vrot.slane %v1234_v3, 1 }
 0x1d7   : > { %v1226_v56 = vrot.slane %v1225_v2, 1  ;;  %v1241_v33 = vadd.f32 %v1240_v24, %v1239_v54  ;;  %v1260_v53 = vadd.f32 %v2210_v62, %v1218_v26 }
 0x1d8   : > { %v1236_v18 = vadd.f32 %v1235_v47, %v1234_v3 }
 0x1d9   : > { %v1227_v34 = vadd.f32 %v1226_v56, %v1225_v2  ;;  %v1242_v28 = vrot.slane %v1241_v33, 2 }
 0x1da   : > { %v1262_v15 = vadd.f32 %v2210_v62, %v1236_v18 }
 0x1db   : > { %v1261_v23 = vadd.f32 %v2210_v62, %v1227_v34  ;;  %v1243_v29 = vadd.f32 %v1242_v28, %v1241_v33 }
 0x1dd   : > { %v1289_v12 = vcombine.low %v1260_v53, %v1261_v23  ;;  %v1244_v37 = vrot.slane %v1243_v29, 1 }
 0x1df   : > { %v1245_v13 = vadd.f32 %v1244_v37, %v1243_v29  ;;  %v1297_v40 = vrot.slane %v1289_v12, %v1279_v7 }
 0x1e1   : > { %v1263_v43 = vadd.f32 %v2210_v62, %v1245_v13  ;;  %v1320_v62 = vrot.slane %v1310_v27, %v1319_v1 }
 0x1e3   : > { %v1290_v39 = vcombine.low %v1262_v15, %v1263_v43 }
 0x1e5   : > { %v1304_v55 = vrot.slane %v1290_v39, %v1279_v7 }
 0x1e7   : > { %v1305_v5 = vcombine.low %v1297_v40, %v1304_v55 }
 0x1e9   : > { %v1309_v63 = vmul.f32 %v1640_v52, %v1305_v5 }
 0x1eb   : > { %v1311_v22 = vmul.f32 0.027777778, %v1309_v63 }
 0x1ed   : > { %v1327_v4 = vrot.slane %v1311_v22, %v1319_v1 }
 0x1ef   : > { %v1328_v8 = vcombine.low %v1320_v62, %v1327_v4 }
 0x1f1   : > { %1330 = vst [vmem:[%s301_s18] sm:$0xff] %v1328_v8 }
 0x1f2   : > { %1654 = shalt.err (!%p1651_p3)
}
 0x1f3   : > { %s1655_s27 = scalar_lea.hbm %s2285_s23, 128  ;;  %s1659_s13 = scalar_lea.hbm %s2335_s8, 384 }
 0x1f4   : > { %p1656_p4 = scmp.ne.s32.totalorder %s2285_s23, %s1655_s27  ;;  %p1660_p9 = scmp.lt.u32.totalorder %s2285_s23, %s2335_s8 }
 0x1f5   : > { %p1661_p10 = scmp.lt.u32.totalorder %s1659_s13, %s1655_s27  ;;  %p1663_p12 = scmp.lt.u32.totalorder %s1655_s27, %s2285_s23 }
 0x1f6   : > { %p1657_p7 = pnand %p1656_p4, %p1796_p5 }
 0x1f7   : > { %p1662_p11 = por %p1661_p10, %p1660_p9 }
 0x1f8   : > { %p1658_p8 = pneg %p1657_p7 }
 0x1f9   : > { %p1664_p13 = por %p1663_p12, %p1662_p11 }
 0x1fb   : > { %p1665_p0 = pnand %p1664_p13, %p1658_p8 }
 0x1fd   : > { %1668 = shalt.err (!%p1665_p0)
}
 0x1fe   : > { %1466 = dma.vmem_to_hbm [thread:$0]  (%p1796_p5), %s2287_s19, 128, %s2285_s23, %s1332_s20  }
 0x1ff PF: > { %p1472_p1 = scmp.ge.s32.totalorder %s1703_s10, 2  ;;  %s1358_s21 = sand.u32 1, %s1691_s29  }
 0x200   : > { %s1359_s22 = scalar_lea.sflag [#allocation4], %s1358_s21 }
 0x201   : > { %p1469_p2 = pnand %p1472_p1, %p1800_p6 }
 0x203   : > { %1686 = dma.done.wait (!%p1469_p2), %s1359_s22, 128  }
 0x204   : > { %1688 = vsyncadd (!%p1469_p2), %s1359_s22, 4294967168  ;;  %p20_p3 = scmp.ge.s32.totalorder %s1783_s12, 5   ;;  %s2354_s29 = smov %s1695_s30 }
 0x205   : > { %s2355_s30 = smov %s1699_s9  ;;  %s2356_s9 = smov %s1794_s15 }
 0x206   : > { %s2357_s10 = smov %s1783_s12  ;;  %22 = sbr.rel (!%p20_p3) target bundleno = 6 (0x6), region = 87 }
 0x20d   :  { %1364 = vsyncpa [#allocation4], 1 }
 0x20e   :  { %1366 = vsyncpa [#allocation4 + $0x1], 1 }

</bundles_post_ra>
